<compile_context>
chip_gen: v5e
topology: v5e:2x2
jax: 0.10.0
libtpu: 0.0.40
codegen_flags: <defaults>
</compile_context>

<pallas_src>
import functools
import math

import jax
import jax.numpy as jnp
from jax.experimental import pallas as pl
from jax.experimental.pallas import tpu as pltpu


# ---------------------------------------------------------------------------
# Kernels (pure elementwise; streamed lane-dense by the wrapper below).
# ---------------------------------------------------------------------------

def _heaviside_kernel(x_ref, o_ref):
    # (x >= 0) cast back to x's dtype, exactly like `(x >= 0).to(x)` in torch.
    o_ref[...] = (x_ref[...] >= 0).astype(o_ref.dtype)


def _rect_grad_kernel(x_ref, g_ref, o_ref, *, lens):
    # Rectangular surrogate gradient: g * (|x| < lens).
    mask = jnp.abs(x_ref[...]) < lens
    o_ref[...] = g_ref[...] * mask.astype(o_ref.dtype)


# ---------------------------------------------------------------------------
# Generic lane-dense elementwise streaming harness.
# ---------------------------------------------------------------------------

def _round_up(a: int, b: int) -> int:
    return ((a + b - 1) // b) * b


def _generation_budget():
    """(resident_vmem_budget_bytes, vmem_limit_bytes_or_None, has_two_cores)."""
    kind = ""
    try:
        kind = jax.devices()[0].device_kind.lower()
    except Exception:
        pass
    if "v7" in kind:
        # 64 MiB physical / 32 MiB default scoped: raise the limit, big tiles.
        return 32 << 20, 48 << 20, True
    if "v6" in kind:
        # 32 MiB default scoped VMEM: ~16 MiB resident fits with no flags.
        return 16 << 20, None, False
    # v5e (16 MiB default scoped) and anything unknown: stay conservative.
    return 8 << 20, None, False


def _elementwise_pallas(kernel, out_dtype, *arrays):
    """Streams same-shaped arrays through an elementwise Pallas kernel.

    Layout: flatten and view as (rows, lane) where lane is a multiple-of-128
    divisor of the element count (free reshape, unmasked full-width vld/vst),
    then tile rows by a per-generation byte budget. The last row block may be
    ragged; Pallas masks it -- no jnp.pad / slice round-trips on the hot path.
    """
    shape = arrays[0].shape
    total = math.prod(shape) if shape else 1
    if total == 0:
        return jnp.zeros(shape, out_dtype)

    resident_budget, vmem_limit, two_cores = _generation_budget()
    # Double-buffered inputs + output share the resident-VMEM budget.
    n_bufs = len(arrays) + 1
    block_bytes = max(resident_budget // (2 * n_bufs), 128 * 1024)

    dtypes = [a.dtype for a in arrays] + [out_dtype]
    max_itemsize = max(jnp.dtype(d).itemsize for d in dtypes)
    # Sublane packing: 8 rows/vreg for 32-bit, 16 for bf16/f16, 32 for int8.
    sublane_mult = max(8 * max(1, 4 // jnp.dtype(d).itemsize) for d in dtypes)

    lane = next((c for c in (1024, 512, 256, 128) if total % c == 0), None)

    if lane is None:
        if total <= (1 << 17):
            # Small, unaligned tensor: single whole-array block (masked tail).
            flats = [a.reshape(1, total) for a in arrays]
            out2d = pl.pallas_call(
                kernel,
                out_shape=jax.ShapeDtypeStruct((1, total), out_dtype),
            )(*flats)
            return out2d.reshape(shape)
        # Rare large, non-multiple-of-128 case: pad once and recurse.
        # TODO(synk): this fallback pays extra HBM copies for the pad + slice.
        pad_to = _round_up(total, 1024)
        flats = [jnp.pad(a.reshape(-1), (0, pad_to - total)) for a in arrays]
        out = _elementwise_pallas(kernel, out_dtype, *flats)
        return out[:total].reshape(shape)

    rows = total // lane
    flats = [a.reshape(rows, lane) for a in arrays]  # free reshape, no pad

    budget_rows = (block_bytes // (lane * max_itemsize)) // sublane_mult
    budget_rows = max(budget_rows * sublane_mult, sublane_mult)

    if rows <= budget_rows:
        if two_cores and rows >= 2 * sublane_mult:
            # Split the single block in two so both v7x TensorCores get work.
            row_tile = _round_up(-(-rows // 2), sublane_mult)
        else:
            row_tile = rows  # block == full array dims (allowed unaligned)
    else:
        row_tile = budget_rows
    grid = pl.cdiv(rows, row_tile)

    out2d = pl.pallas_call(
        kernel,
        out_shape=jax.ShapeDtypeStruct((rows, lane), out_dtype),
        grid_spec=pltpu.PrefetchScalarGridSpec(
            num_scalar_prefetch=0,
            grid=(grid,),
            in_specs=[pl.BlockSpec((row_tile, lane), lambda i: (i, 0))
                      for _ in flats],
            out_specs=pl.BlockSpec((row_tile, lane), lambda i: (i, 0)),
        ),
        compiler_params=pltpu.CompilerParams(
            dimension_semantics=("parallel",),
            vmem_limit_bytes=vmem_limit,
        ),
        # NOTE: input_output_aliases={0: 0} would drop one HBM allocation if
        # callers donate x; left off so x stays live for the backward pass.
    )(*flats)
    return out2d.reshape(shape)


# ---------------------------------------------------------------------------
# Rect module: forward + rectangular-surrogate backward (custom_vjp).
# ---------------------------------------------------------------------------

@functools.partial(jax.custom_vjp, nondiff_argnums=(1,))
def rect_forward(x, lens=0.5):
    """Forward of Rect / rect.apply(x, lens): heaviside(x).

    `lens` only shapes the surrogate backward (rectangular window |x| < lens).
    """
    return _elementwise_pallas(_heaviside_kernel, x.dtype, x)


def _rect_fwd(x, lens):
    return _elementwise_pallas(_heaviside_kernel, x.dtype, x), x


def _rect_bwd(lens, x, g):
    kern = functools.partial(_rect_grad_kernel, lens=float(lens))
    return (_elementwise_pallas(kern, g.dtype, x, g),)


rect_forward.defvjp(_rect_fwd, _rect_bwd)


if __name__ == "__main__":
    key = jax.random.PRNGKey(0)
    # Small NCHW input consistent with how Rect is used inside conv blocks.
    x = jax.random.normal(key, (2, 4, 16, 16), dtype=jnp.float32)
    lens = 0.5

    # Forward.
    y = jax.block_until_ready(rect_forward(x, lens))
    ref_y = (x >= 0).astype(x.dtype)
    assert y.shape == x.shape and y.dtype == x.dtype
    assert bool(jnp.all(y == ref_y))

    # Rectangular-surrogate backward (grad * (|x| < lens)).
    gx = jax.block_until_ready(
        jax.grad(lambda v: jnp.sum(rect_forward(v, lens)))(x))
    ref_gx = (jnp.abs(x) < lens).astype(x.dtype)
    assert gx.shape == x.shape and gx.dtype == x.dtype
    assert bool(jnp.all(gx == ref_gx))

    print("KERNEL_OK")
</pallas_src>

<mosaic_0001>
module attributes {stable_mosaic.version = 11 : i64} {
  func.func @_heaviside_kernel(%arg0: i32, %arg1: memref<2x1024xf32, #tpu.memory_space<vmem>>, %arg2: memref<2x1024xf32, #tpu.memory_space<vmem>>) attributes {dimension_semantics = [#tpu.dimension_semantics<parallel>], iteration_bounds = array<i64: 1>, scalar_prefetch = 0 : i64, scratch_operands = 0 : i64, tpu.core_type = #tpu.core_type<tc>, window_params = [{transform_indices = @transform_0, window_bounds = array<i64: 2, 1024>}, {transform_indices = @transform_1, window_bounds = array<i64: 2, 1024>}]} {
    %c0 = arith.constant 0 : index
    %c0_0 = arith.constant 0 : index
    %0 = vector.load %arg1[%c0, %c0_0] : memref<2x1024xf32, #tpu.memory_space<vmem>>, vector<2x1024xf32>
    %cst = arith.constant 0.000000e+00 : f32
    %1 = vector.broadcast %cst : f32 to vector<2x1024xf32>
    %2 = arith.cmpf oge, %0, %1 : vector<2x1024xf32>
    %3 = arith.extui %2 : vector<2x1024xi1> to vector<2x1024xi32>
    %4 = arith.sitofp %3 : vector<2x1024xi32> to vector<2x1024xf32>
    %c0_1 = arith.constant 0 : index
    %c0_2 = arith.constant 0 : index
    %5 = vector.load %arg2[%c0_1, %c0_2] : memref<2x1024xf32, #tpu.memory_space<vmem>>, vector<2x1024xf32>
    tpu.vector_store %arg2[%c0_1, %c0_2], %4 {strides = array<i32>} : memref<2x1024xf32, #tpu.memory_space<vmem>>, vector<2x1024xf32>,
    return
  }
  func.func @transform_0(%arg0: i32) -> (i32, i32) {
    %c0_i32 = arith.constant 0 : i32
    %c0_i32_0 = arith.constant 0 : i32
    return %arg0, %c0_i32 : i32, i32
  }
  func.func @transform_1(%arg0: i32) -> (i32, i32) {
    %c0_i32 = arith.constant 0 : i32
    %c0_i32_0 = arith.constant 0 : i32
    return %arg0, %c0_i32 : i32, i32
  }
}

</mosaic_0001>

<bundles_post_ra>
// kernel: tpu_custom_call.1
= control target key start
LH: loop header
LB: loop body
LE: loop exit
PB: predicated region body
PF: predicated region fallthrough
CT: control target
= control target key end

     0   :  { %6 = vsyncpa [#allocation3], 0  ;;  %s126_s0 = inlined_call_operand.hbm [shape: f32[2,1024], index: 0, kind: input, shape index: {}]   ;;  %s127_s1 = inlined_call_operand.hbm [shape: f32[2,1024], index: 1, kind: output, shape index: {}]  }
   0x1   :  { %7 = vsyncpa [#allocation4], 0  ;;  %s13_s8 = sshll.u32 %s126_s0, 4  ;;  %s107_s9 = smov [#allocation2]   ;;  %s14_s8 = int_to_ptr.hbm [resolvable:$true] %s13_s8 }
   0x2   :  { %s15_s10 = sshll.u32 %s107_s9, 4  ;;  %s16_s10 = int_to_ptr.vmem [resolvable:$true] %s15_s10 }
   0x3   :  { %18 = dma.hbm_to_vmem [thread:$0]  %s14_s8, 256, %s16_s10, [#allocation3]  }
   0x4   :  { %103 = dma.done.wait [#allocation3], 256  }
   0x5   :  { %104 = vsyncadd [#allocation3], 4294967040  ;;  %s108_s11 = smov [#allocation5]   ;;  %s40_s15 = sshll.u32 %s127_s1, 4  ;;  %v23_v0 = vld [vmem:[#allocation2] sm:$0xff]  ;;  %v24_v1 = vld [vmem:[#allocation2 + $0x8] sm:$0xff]  ;;  %s41_s15 = int_to_ptr.hbm [resolvable:$true] %s40_s15 }
   0x6   :  { %s38_s12 = sshll.u32 %s108_s11, 4  ;;  %vm25_vm0 = vcmp.ge.f32.partialorder %v23_v0, 0.0  ;;  %vm26_vm1 = vcmp.ge.f32.partialorder %v24_v1, 0.0  ;;  %v109_v2 = vmov 0.0   ;;  %s39_s12 = int_to_ptr.vmem [resolvable:$true] %s38_s12 }
   0x7   :  { %v50_v3 = vsel %vm25_vm0, 1.0, %v109_v2  ;;  %v51_v4 = vsel %vm26_vm1, 1.0, %v109_v2 }
   0x8   :  { %31 = vst [vmem:[#allocation5] sm:$0xff] %v50_v3 }
   0x9   :  { %32 = vst [vmem:[#allocation5 + $0x8] sm:$0xff] %v51_v4 }
   0xa   :  { %43 = dma.vmem_to_hbm [thread:$0]  %s39_s12, 256, %s41_s15, [#allocation4]  }
   0xb   :  { %105 = dma.done.wait [#allocation4], 256  }
   0xc   :  { %106 = vsyncadd [#allocation4], 4294967040 }
   0xd   :  { %48 = vsyncpa [#allocation3], 1 }
   0xe   :  { %49 = vsyncpa [#allocation4], 1 }

</bundles_post_ra>
